<compile_context>
chip_gen: v5e
topology: v5e:2x2
jax: 0.10.0
libtpu: 0.0.40
codegen_flags: <defaults>
</compile_context>

<pallas_src>
import jax
import jax.numpy as jnp
from jax.experimental import pallas as pl
from jax.experimental.pallas import tpu as pltpu


def fused_affine_kernel(w_ref, b_ref, x_ref, o_ref):
    # w_ref: (20, 5)   effective weight, transposed (feature-major)
    # b_ref: (20, 1)   effective bias column
    # x_ref: (5, TB)   batch tile, batch on lanes (lane-dense)
    # o_ref: (20, TB)  output tile, batch on lanes (lane-dense, unmasked stores)
    out = jnp.dot(w_ref[...], x_ref[...], preferred_element_type=jnp.float32)
    o_ref[...] = (out + b_ref[...]).astype(o_ref.dtype)


def checked_model_forward(x, params, *, tb=512):
    """x: (B, 5) float32 -> (B, 20) float32."""
    w1, b1, w2, b2, w3, b3 = params

    # Fold the three affine layers into one (no nonlinearity between them).
    w_eff = w1 @ w2 @ w3                   # (5, 20)
    b_eff = (b1 @ w2 + b2) @ w3 + b3       # (1, 20)

    B = x.shape[0]
    tb = min(tb, B)                        # block dim must divide into B or equal it

    # Feature-major layout: batch maps to the lane (last) axis inside the kernel.
    xt = x.T                               # (5, B)
    w_t = jnp.asarray(w_eff.T)             # (20, 5)
    b_col = jnp.asarray(b_eff.T)           # (20, 1)

    grid = (pl.cdiv(B, tb),)
    out_t = pl.pallas_call(
        fused_affine_kernel,
        out_shape=jax.ShapeDtypeStruct((20, B), jnp.float32),
        grid=grid,
        in_specs=[
            pl.BlockSpec((20, 5), lambda i: (0, 0)),   # W_eff^T, resident
            pl.BlockSpec((20, 1), lambda i: (0, 0)),   # b_eff column, resident
            pl.BlockSpec((5, tb), lambda i: (0, i)),   # x tile, batch on lanes
        ],
        out_specs=pl.BlockSpec((20, tb), lambda i: (0, i)),
        compiler_params=pltpu.CompilerParams(
            dimension_semantics=("parallel",)),        # shard batch tiles across TCs
    )(w_t, b_col, xt)

    return out_t.T                                     # back to (B, 20)


def init_params(key):
    """Deterministic init mirroring the nn.Linear shapes.

    PyTorch Linear stores weight as (out, in); we store the transpose
    (in, out) so the math reads x @ W + b. Biases are (1, out).
    """
    ks = jax.random.split(key, 6)

    def lin(kw, kb, fan_in, fan_out):
        bound = 1.0 / jnp.sqrt(fan_in)
        w = jax.random.uniform(kw, (fan_in, fan_out), jnp.float32, -bound, bound)
        b = jax.random.uniform(kb, (1, fan_out), jnp.float32, -bound, bound)
        return w, b

    w1, b1 = lin(ks[0], ks[1], 5, 10)    # sub1.fc1
    w2, b2 = lin(ks[2], ks[3], 10, 20)   # sub1.fc2
    w3, b3 = lin(ks[4], ks[5], 20, 20)   # sub2.fc1
    return (w1, b1, w2, b2, w3, b3)


def reference_forward(x, params):
    """Unfused reference, matching the PyTorch layer-by-layer computation."""
    w1, b1, w2, b2, w3, b3 = params
    h1 = x @ w1 + b1
    h2 = h1 @ w2 + b2
    return h2 @ w3 + b3


if __name__ == "__main__":
    key = jax.random.PRNGKey(0)
    kx, kp = jax.random.split(key)

    B = 256
    x = jax.random.normal(kx, (B, 5), jnp.float32)
    params = init_params(kp)

    # tb=128 exercises a multi-step grid (2 batch tiles) while staying small.
    out = checked_model_forward(x, params, tb=128)
    out = jax.block_until_ready(out)

    ref = reference_forward(x, params)
    assert out.shape == (B, 20)
    # Folding the affine chain reorders f32 reductions slightly; tolerance
    # reflects that (still tight: errors are a few ulps at these sizes).
    assert jnp.allclose(out, ref, atol=1e-5, rtol=1e-4)
    print("KERNEL_OK")
</pallas_src>

<mosaic_0001>
module attributes {stable_mosaic.version = 11 : i64} {
  func.func @fused_affine_kernel(%arg0: i32, %arg1: memref<20x5xf32, #tpu.memory_space<vmem>>, %arg2: memref<20x1xf32, #tpu.memory_space<vmem>>, %arg3: memref<5x128xf32, #tpu.memory_space<vmem>>, %arg4: memref<20x128xf32, #tpu.memory_space<vmem>>) attributes {dimension_semantics = [#tpu.dimension_semantics<parallel>], iteration_bounds = array<i64: 2>, scalar_prefetch = 0 : i64, scratch_operands = 0 : i64, tpu.core_type = #tpu.core_type<tc>, window_params = [{pipeline_mode = #tpu.pipeline_mode<synchronous>, transform_indices = @transform_0, window_bounds = array<i64: 20, 5>}, {pipeline_mode = #tpu.pipeline_mode<synchronous>, transform_indices = @transform_1, window_bounds = array<i64: 20, 1>}, {transform_indices = @transform_2, window_bounds = array<i64: 5, 128>}, {transform_indices = @transform_3, window_bounds = array<i64: 20, 128>}]} {
    %c0 = arith.constant 0 : index
    %c0_0 = arith.constant 0 : index
    %0 = vector.load %arg1[%c0, %c0_0] : memref<20x5xf32, #tpu.memory_space<vmem>>, vector<20x5xf32>
    %c0_1 = arith.constant 0 : index
    %c0_2 = arith.constant 0 : index
    %1 = vector.load %arg3[%c0_1, %c0_2] : memref<5x128xf32, #tpu.memory_space<vmem>>, vector<5x128xf32>
    %cst = arith.constant dense<0.000000e+00> : vector<20x128xf32>
    %2 = tpu.matmul %0, %1, %cst {dimension_numbers = #tpu.dot_dimension_numbers<[1], [0], [0], [1], [0, 0, 1, 1], [], []>} : vector<20x5xf32>, vector<5x128xf32>, vector<20x128xf32> -> vector<20x128xf32>
    %c0_3 = arith.constant 0 : index
    %c0_4 = arith.constant 0 : index
    %3 = vector.load %arg2[%c0_3, %c0_4] : memref<20x1xf32, #tpu.memory_space<vmem>>, vector<20x1xf32>
    %4 = vector.broadcast %3 : vector<20x1xf32> to vector<20x128xf32>
    %5 = arith.addf %2, %4 : vector<20x128xf32>
    %c0_5 = arith.constant 0 : index
    %c0_6 = arith.constant 0 : index
    %6 = vector.load %arg4[%c0_5, %c0_6] : memref<20x128xf32, #tpu.memory_space<vmem>>, vector<20x128xf32>
    tpu.vector_store %arg4[%c0_5, %c0_6], %5 {strides = array<i32>} : memref<20x128xf32, #tpu.memory_space<vmem>>, vector<20x128xf32>,
    return
  }
  func.func @transform_0(%arg0: i32) -> (i32, i32) {
    %c0_i32 = arith.constant 0 : i32
    %c0_i32_0 = arith.constant 0 : i32
    %c0_i32_1 = arith.constant 0 : i32
    return %c0_i32, %c0_i32_0 : i32, i32
  }
  func.func @transform_1(%arg0: i32) -> (i32, i32) {
    %c0_i32 = arith.constant 0 : i32
    %c0_i32_0 = arith.constant 0 : i32
    %c0_i32_1 = arith.constant 0 : i32
    return %c0_i32, %c0_i32_0 : i32, i32
  }
  func.func @transform_2(%arg0: i32) -> (i32, i32) {
    %c0_i32 = arith.constant 0 : i32
    %c0_i32_0 = arith.constant 0 : i32
    return %c0_i32, %arg0 : i32, i32
  }
  func.func @transform_3(%arg0: i32) -> (i32, i32) {
    %c0_i32 = arith.constant 0 : i32
    %c0_i32_0 = arith.constant 0 : i32
    return %c0_i32, %arg0 : i32, i32
  }
}

</mosaic_0001>

<bundles_post_ra>
// kernel: tpu_custom_call.1
= control target key start
LH: loop header
LB: loop body
LE: loop exit
PB: predicated region body
PF: predicated region fallthrough
CT: control target
= control target key end

     0   :  { %8 = vsyncpa [#allocation3], 0  ;;  %s559_s0 = inlined_call_operand.vmem [shape: f32[20,5], index: 0, kind: input, shape index: {}]   ;;  %s560_s1 = inlined_call_operand.vmem [shape: f32[20,1], index: 1, kind: input, shape index: {}]   ;;  %s561_s2 = inlined_call_operand.vmem [shape: f32[5,256], index: 2, kind: input, shape index: {}]   ;;  %s562_s3 = inlined_call_operand.hbm [shape: f32[20,256], index: 3, kind: output, shape index: {}]  }
   0x1   :  { %10 = vsyncpa [#allocation3 + $0x1], 0  ;;  %s456_s12 = smov 0   ;;  %s458_s13 = smov 0  }
   0x2   :  { %s460_s14 = smov 0   ;;  %s462_s15 = smov 0  }
   0x3 LB: > { %s477_s16 = sadd.s32 4294967295, %s430_s15   ;;  %s308_s17 = sadd.s32 4294967294, %s430_s15   ;;  %s430_s15 = sphi %s462_s15, %s568_s15   ;;  %s426_s14 = sphi %s460_s14, %s567_s14   ;;  %s422_s13 = sphi %s458_s13, %s566_s13   ;;  %s418_s12 = sphi %s456_s12, %s565_s12  }
   0x4   : > { %s481_s18 = sadd.s32 1, %s430_s15   ;;  %s91_s19 = sadd.s32 1, %s426_s14 }
   0x5   : > { %s88_s20 = ssub.s32 %s430_s15, %s481_s18  ;;  %p101_p0 = scmp.ne.s32.totalorder %s426_s14, %s422_s13 }
   0x6   : > { %p89_p1 = scmp.eq.s32.totalorder %s88_s20, 0  ;;  %p102_p2 = scmp.eq.s32.totalorder %s477_s16, 1 }
   0x7   : > { %p107_p3 = scmp.ne.s32.totalorder %s422_s13, %s418_s12  ;;  %p108_p4 = scmp.eq.s32.totalorder %s308_s17, 1 }
   0x8   : > { %s492_s21 = scalar_select %p89_p1, %s426_s14, %s91_s19  }
   0x9   : > { %p494_p5 = por %p102_p2, %p101_p0  ;;  %p498_p6 = por %p108_p4, %p107_p3 }
   0xa   : > { %p311_p7 = scmp.ge.s32.totalorder %s430_s15, 1  ;;  %p139_p8 = scmp.lt.s32.totalorder %s430_s15, 3 }
   0xc   : > { %p140_p9 = pnand %p311_p7, %p139_p8 }
   0xd   : > { %p162_p10 = scmp.lt.s32.totalorder (!%p140_p9), %s477_s16, 1  ;;  %s159_s20 = sand.u32 (!%p140_p9), 1, %s422_s13  }
   0xe   : > { %143 = sbr.rel (%p140_p9) target bundleno = 165 (0xa5), region = 32  ;;  %s317_s25 = sshll.u32 (!%p140_p9), %s477_s16, 3 }
   0xf   : > { %s322_s24 = smul.u32 (!%p140_p9), 24, %s159_s20  ;;  %s242_s28 = scalar_lea.hbm (!%p140_p9), %s562_s3, %s317_s25 }
  0x10   : > { %s245_s4 = sshll.u32 (!%p140_p9), %s242_s28, 4  ;;  %s388_s9 = scalar_lea.hbm (!%p140_p9), %s562_s3, 48  ;;  %s246_s4 = int_to_ptr.hbm [resolvable:$true] %s245_s4 }
  0x13   : > { %v432_v0 = vmov 0   ;;  %v170_v1 = vld [vmem:[%s560_s1] sm:$0xff]  ;;  %s163_s26 = scalar_select %p162_p10, %s477_s16, 1  ;;  %v172_v2 = vld [vmem:[%s560_s1 + $0x10] sm:$0xf]  ;;  %vm198_vm0 = vcmask 1044480  }
  0x14   : > { %366 = vset.pattern.permute.xlu0 %v432_v0  ;;  %367 = vset.pattern.permute.xlu1 %v432_v0  ;;  %v166_v3 = vld [vmem:[%s559_s0] sm:$0xff]  ;;  %vm188_vm1 = vcmask 39936   ;;  %v167_v5 = vld [vmem:[%s559_s0 + $0x8] sm:$0xff]  ;;  %v168_v6 = vld [vmem:[%s559_s0 + $0x10] sm:$0xf]  ;;  %s232_s16 = scalar_lea.sflag [#allocation3], %s159_s20 }
  0x15   : > { %175 = vperm.xlu0 %366, %v170_v1   ;;  %185 = vperm.xlu1 %367, %v172_v2   ;;  %s312_s29 = sshll.u32 %s163_s26, 3  ;;  %v171_v7 = vld [vmem:[%s560_s1 + $0x8] sm:$0xff] }
  0x16   : > { %s165_s5 = scalar_lea.vmem %s561_s2, %s312_s29  ;;  %s161_s29 = scalar_lea.vmem [#allocation2], %s322_s24 }
  0x17   : > { %v169_v4 = vld [vmem:[%s165_s5] sm:$0x1f]  ;;  %s243_s30 = sshll.u32 %s161_s29, 4  ;;  %s382_s5 = sshra.s32 %s246_s4, 4  ;;  %s244_s30 = int_to_ptr.vmem [resolvable:$true] %s243_s30  ;;  %s383_s5 = int_to_ptr.hbm [resolvable:$true] %s382_s5 }
  0x18   : > { %313 = vmatpush.msk.msra.mxu0 %vm198_vm0, %v169_v4  ;;  %320 = vmatpush.msk.msra.mxu1 %vm198_vm0, %v169_v4  ;;  %s384_s6 = scalar_lea.hbm %s383_s5, 24  ;;  %p389_p0 = scmp.lt.s32.totalorder %s383_s5, %s562_s3 }
  0x19   : > { %321 = vmatpush.msk.msra.mxu2 %vm198_vm0, %v169_v4  ;;  %314 = vmatmul.msk.f32.vlgmr.msra.gmra.mxu0 %vm188_vm1, %v166_v3  ;;  %p385_p11 = scmp.ne.s32.totalorder %s383_s5, %s384_s6  ;;  %p390_p1 = scmp.lt.s32.totalorder %s388_s9, %s384_s6 }
  0x1a   : > { %315 = vmatmul.msk.f32.vlgmr.msra.gmra.mxu1 %vm188_vm1, %v167_v5  ;;  %316 = vmatmul.msk.f32.vlgmr.msra.gmra.mxu2 %vm188_vm1, %v168_v6 }
  0x1b   : > { %p386_p12 = pnand %p385_p11, %p494_p5  ;;  %p391_p2 = por %p390_p1, %p389_p0 }
  0x1d   : > { %180 = vperm.xlu0 %366, %v171_v7   ;;  %p387_p13 = pneg %p386_p12 }
  0x1f   : > { %p392_p3 = pnand %p391_p2, %p387_p13 }
  0x87   : > { %v176_v8 = vpop.permute.xlu0 %175  ;;  %v186_v14 = vpop.permute.xlu1 %185 }
  0x8f   : > { %v181_v10 = vpop.permute.xlu0 %180 }
  0x96   : > { %v219_v9 = vpop.f32.mrf.mxu0 }
  0x97   : > { %v220_v11 = vadd.f32 %v219_v9, %v176_v8  ;;  %v222_v12 = vpop.f32.mrf.mxu1 }
  0x98   : > { %v223_v13 = vadd.f32 %v222_v12, %v181_v10 }
  0x99   : > { %228 = vst [vmem:[%s161_s29] sm:$0xff] %v220_v11 }
  0x9a   : > { %229 = vst [vmem:[%s161_s29 + $0x8] sm:$0xff] %v223_v13 }
  0x9d   : > { %v225_v15 = vpop.f32.mrf.mxu2 }
  0x9e   : > { %v226_v16 = vadd.f32 %v225_v15, %v186_v14 }
  0xa0   : > { %230 = vst [vmem:[%s161_s29 + $0x10] sm:$0xf] %v226_v16 }
  0xa1   : > { %395 = shalt.err (!%p392_p3)
}
  0xa2   : > { %s433_s17 = smov 128   ;;  %s434_s19 = smov 256  }
  0xa3   : > { %s435_s20 = smov 8  }
  0xa4   : > { %323 = dma.vmem_to_hbm [thread:$0]  (%p494_p5), %s244_s30, 384, %s246_s4, %s232_s16, %s433_s17, %s434_s19, %s435_s20  }
  0xa5 PF: > { %p329_p4 = scmp.ge.s32.totalorder %s430_s15, 2  ;;  %s260_s24 = sand.u32 1, %s418_s12  }
  0xa6   : > { %s261_s25 = scalar_lea.sflag [#allocation3], %s260_s24 }
  0xa7   : > { %p326_p7 = pnand %p329_p4, %p498_p6 }
  0xa9   : > { %p327_p8 = pneg %p326_p7 }
  0xab   : > { %413 = dma.done.wait (%p327_p8), %s261_s25, 384  }
  0xac   : > { %415 = vsyncadd (%p327_p8), %s261_s25, 4294966912  ;;  %p13_p9 = scmp.ge.s32.totalorder %s481_s18, 4   ;;  %s565_s12 = smov %s422_s13 }
  0xad   : > { %s566_s13 = smov %s426_s14  ;;  %s567_s14 = smov %s492_s21 }
  0xae   : > { %s568_s15 = smov %s481_s18  ;;  %15 = sbr.rel (!%p13_p9) target bundleno = 3 (0x3), region = 67 }
  0xb3   :  { %267 = vsyncpa [#allocation3], 1 }
  0xb4   :  { %269 = vsyncpa [#allocation3 + $0x1], 1 }

</bundles_post_ra>
